<compile_context>
chip_gen: v5e
topology: v5e:2x2
jax: 0.10.0
libtpu: 0.0.40
codegen_flags: <defaults>
</compile_context>

<pallas_src>
import functools

import jax
import jax.numpy as jnp
from jax.experimental import pallas as pl
from jax.experimental.pallas import tpu as pltpu


def _round_up(a, b):
    return (a + b - 1) // b * b


def _vmem_capacity_bytes():
    """Physical VMEM per TensorCore; conservative (v7x-sized) default on failure."""
    try:
        info = pltpu.get_tpu_info()
        cap = int(getattr(info, "vmem_capacity_bytes", 0) or 0)
        if cap > 0:
            return cap
    except Exception:
        pass
    return 64 * 1024 * 1024


def _decomp_mxu_kernel(x_ref, band_ref, res_ref, mean_ref, *, kernel_size, n_splits):
    """Moving average via the MXU: window = x_tile @ band (band = 0/1 moving-sum matrix)."""
    inv_k = 1.0 / kernel_size
    band = band_ref[...]                      # (L, L) bf16, exactly 0/1
    x = x_ref[...]
    x_f32 = x.astype(jnp.float32)

    if n_splits <= 1:
        # bf16 input: single matmul, f32 accumulation.
        window = jnp.dot(x.astype(jnp.bfloat16), band,
                         preferred_element_type=jnp.float32)
    else:
        # f32 input: split x into exact bf16 hi/mid/lo parts.  part * {0,1} is
        # exact and accumulation is f32, so the result matches a full-f32 sum
        # (no bf16 demotion of x), while every pass runs on the idle MXU.
        parts = []
        rem = x_f32
        for _ in range(n_splits):
            part = rem.astype(jnp.bfloat16)
            rem = rem - part.astype(jnp.float32)
            parts.append(part)
        window = jnp.dot(parts[0], band, preferred_element_type=jnp.float32)
        for part in parts[1:]:
            window = window + jnp.dot(part, band, preferred_element_type=jnp.float32)

    mean = window * inv_k                     # count_include_pad: always divide by k
    mean_ref[...] = mean.astype(mean_ref.dtype)
    res_ref[...] = (x_f32 - mean).astype(res_ref.dtype)


def _decomp_vpu_kernel(x_ref, res_ref, mean_ref, *, kernel_size):
    """Direct 2-accumulator shifted-slice sum (small-L / very-long-L fallback)."""
    k = kernel_size
    p = k // 2
    L = x_ref.shape[-1]
    tr = x_ref.shape[0]
    x = x_ref[...].astype(jnp.float32)        # single load + cast, reused below
    if p > 0:
        zpad = jnp.zeros((tr, p), jnp.float32)
        xpad = jnp.concatenate([zpad, x, zpad], axis=1)
    else:
        xpad = x
    acc = xpad[:, 0:L]
    if k > 1:
        acc2 = xpad[:, 1:1 + L]
        for j in range(2, k, 2):
            acc = acc + xpad[:, j:j + L]
        for j in range(3, k, 2):
            acc2 = acc2 + xpad[:, j:j + L]
        acc = acc + acc2
    mean = acc * (1.0 / k)
    mean_ref[...] = mean.astype(mean_ref.dtype)
    res_ref[...] = (x - mean).astype(res_ref.dtype)


def _choose_row_tile(R, cap):
    """Row tile TR (multiple of 8, or == padded row count) and padded row count Rp."""
    cap = max(8, (cap // 8) * 8)
    hi = min(cap, (R // 8) * 8)
    divs = [d for d in range(8, hi + 1, 8) if R % d == 0]
    if divs:
        best = divs[-1]
        even = [d for d in divs if (R // d) % 2 == 0]
        # Prefer an even grid-step count (balances v7x's two TensorCores) as long
        # as it does not shrink the tile by more than 4x.
        if even and even[-1] * 4 >= best:
            return even[-1], R
        return best, R
    if R <= cap:
        return R, R                          # single block covering the full row extent
    # Rare fallback: no usable multiple-of-8 divisor and rows do not fit one tile.
    Rp = _round_up(R, 8)
    tr = min(cap, Rp)
    while Rp % tr:
        tr -= 8
    return tr, Rp


def series_decomp(x, kernel_size, *, use_mxu=None):
    """x: (N, C, L) -> (res, moving_mean), both (N, C, L). Matches torch SeriesDecomp."""
    assert kernel_size % 2 == 1, "use an odd kernel_size (as in DLinear)"
    N, C, L = x.shape
    R = N * C
    p = kernel_size // 2
    x2 = x.reshape(R, L)
    itemsize = x.dtype.itemsize

    vmem_cap = _vmem_capacity_bytes()
    vmem_limit = min(vmem_cap * 3 // 4, 100 * 1024 * 1024)

    # MXU (banded-matmul) path: worth it once the lane axis is dense (L >= 128)
    # and while the (L, L) band stays a small fraction of VMEM.
    max_band_len = 2048 if vmem_cap <= 64 * 1024 * 1024 else 3072
    if use_mxu is None:
        use_mxu = 128 <= L <= max_band_len

    band_bytes = 4 * L * L if use_mxu else 0           # bf16 band, double-buffered
    per_row = 6 * L * itemsize + 16 * L                # dbl-buffered blocks + f32 temps
    budget = vmem_limit - band_bytes - (2 << 20)
    cap = max(8, min(1024, budget // per_row))
    TR, Rp = _choose_row_tile(R, cap)

    if Rp != R:
        # Rare: no clean row tiling exists; padded zero rows are inert for this op.
        x2 = jnp.pad(x2, ((0, Rp - R), (0, 0)))

    out_shape = (jax.ShapeDtypeStruct((Rp, L), x.dtype),
                 jax.ShapeDtypeStruct((Rp, L), x.dtype))
    row_spec = pl.BlockSpec((TR, L), lambda i: (i, 0))
    compiler_params = pltpu.CompilerParams(
        dimension_semantics=("parallel",),
        vmem_limit_bytes=int(vmem_limit),
    )
    grid = (Rp // TR,)

    if use_mxu:
        idx = jnp.arange(L, dtype=jnp.int32)
        band = (jnp.abs(idx[:, None] - idx[None, :]) <= p).astype(jnp.bfloat16)
        n_splits = 1 if x.dtype == jnp.bfloat16 else 3
        kernel = functools.partial(_decomp_mxu_kernel,
                                   kernel_size=kernel_size, n_splits=n_splits)
        res, mean = pl.pallas_call(
            kernel,
            out_shape=out_shape,
            grid=grid,
            in_specs=[row_spec, pl.BlockSpec((L, L), lambda i: (0, 0))],
            out_specs=(row_spec, row_spec),
            compiler_params=compiler_params,
        )(x2, band)
    else:
        kernel = functools.partial(_decomp_vpu_kernel, kernel_size=kernel_size)
        res, mean = pl.pallas_call(
            kernel,
            out_shape=out_shape,
            grid=grid,
            in_specs=[row_spec],
            out_specs=(row_spec, row_spec),
            compiler_params=compiler_params,
        )(x2)

    if Rp != R:
        res, mean = res[:R], mean[:R]
    return res.reshape(N, C, L), mean.reshape(N, C, L)


def _reference(x, kernel_size):
    """Pure-JAX f32 reference matching torch AvgPool1d(count_include_pad=True)."""
    p = kernel_size // 2
    L = x.shape[-1]
    xf = x.astype(jnp.float32)
    xpad = jnp.pad(xf, ((0, 0), (0, 0), (p, p)))
    mean = sum(xpad[..., j:j + L] for j in range(kernel_size)) / kernel_size
    return xf - mean, mean


if __name__ == "__main__":
    key = jax.random.PRNGKey(0)
    k1, k2, k3 = jax.random.split(key, 3)

    # 1) Small case (batch=2, channels=4, seq_len=16, k=5): VPU shifted-sum path.
    x1 = jax.random.normal(k1, (2, 4, 16), dtype=jnp.float32)
    res1, mean1 = series_decomp(x1, 5)
    jax.block_until_ready((res1, mean1))
    r1, m1 = _reference(x1, 5)
    assert res1.shape == x1.shape and mean1.shape == x1.shape
    assert jnp.allclose(mean1, m1, atol=1e-5, rtol=1e-5)
    assert jnp.allclose(res1, r1, atol=1e-5, rtol=1e-5)

    # 2) DLinear default kernel_size=25; N*C = 6 exercises the non-multiple-of-8
    #    single-block row tiling (no padding pass).
    x2 = jax.random.normal(k2, (2, 3, 48), dtype=jnp.float32)
    res2, mean2 = series_decomp(x2, 25)
    jax.block_until_ready((res2, mean2))
    r2, m2 = _reference(x2, 25)
    assert jnp.allclose(mean2, m2, atol=1e-5, rtol=1e-5)
    assert jnp.allclose(res2, r2, atol=1e-5, rtol=1e-5)

    # 3) Realistic DLinear sequence length -> banded-matmul MXU path (f32, 3-split).
    x3 = jax.random.normal(k3, (2, 4, 336), dtype=jnp.float32)
    res3, mean3 = series_decomp(x3, 25)
    jax.block_until_ready((res3, mean3))
    r3, m3 = _reference(x3, 25)
    assert jnp.allclose(mean3, m3, atol=1e-5, rtol=1e-5)
    assert jnp.allclose(res3, r3, atol=1e-5, rtol=1e-5)

    # 4) bf16 input -> single-matmul MXU path (f32 accumulation).
    x4 = x3.astype(jnp.bfloat16)
    res4, mean4 = series_decomp(x4, 25)
    jax.block_until_ready((res4, mean4))
    r4, m4 = _reference(x4, 25)
    assert jnp.allclose(mean4.astype(jnp.float32), m4, atol=2e-2, rtol=2e-2)
    assert jnp.allclose(res4.astype(jnp.float32), r4, atol=2e-2, rtol=2e-2)

    print("KERNEL_OK")
</pallas_src>

<mosaic_0001>
module attributes {stable_mosaic.version = 11 : i64} {
  func.func @_decomp_vpu_kernel(%arg0: i32, %arg1: memref<8x16xf32, #tpu.memory_space<vmem>>, %arg2: memref<8x16xf32, #tpu.memory_space<vmem>>, %arg3: memref<8x16xf32, #tpu.memory_space<vmem>>) attributes {dimension_semantics = [#tpu.dimension_semantics<parallel>], iteration_bounds = array<i64: 1>, scalar_prefetch = 0 : i64, scratch_operands = 0 : i64, tpu.core_type = #tpu.core_type<tc>, window_params = [{transform_indices = @transform_0, window_bounds = array<i64: 8, 16>}, {transform_indices = @transform_1, window_bounds = array<i64: 8, 16>}, {transform_indices = @transform_2, window_bounds = array<i64: 8, 16>}]} {
    %c0 = arith.constant 0 : index
    %c0_0 = arith.constant 0 : index
    %0 = vector.load %arg1[%c0, %c0_0] : memref<8x16xf32, #tpu.memory_space<vmem>>, vector<8x16xf32>
    %cst = arith.constant 0.000000e+00 : f32
    %1 = vector.broadcast %cst : f32 to vector<8x2xf32>
    %2 = tpu.concatenate %1, %0, %1 in 1 : vector<8x2xf32>, vector<8x16xf32>, vector<8x2xf32> -> vector<8x20xf32>
    %3 = vector.extract_strided_slice %2 {offsets = [0, 0], sizes = [8, 16], strides = [1, 1]} : vector<8x20xf32> to vector<8x16xf32>
    %4 = vector.extract_strided_slice %2 {offsets = [0, 1], sizes = [8, 16], strides = [1, 1]} : vector<8x20xf32> to vector<8x16xf32>
    %5 = vector.extract_strided_slice %2 {offsets = [0, 2], sizes = [8, 16], strides = [1, 1]} : vector<8x20xf32> to vector<8x16xf32>
    %6 = arith.addf %3, %5 : vector<8x16xf32>
    %7 = vector.extract_strided_slice %2 {offsets = [0, 4], sizes = [8, 16], strides = [1, 1]} : vector<8x20xf32> to vector<8x16xf32>
    %8 = arith.addf %6, %7 : vector<8x16xf32>
    %9 = vector.extract_strided_slice %2 {offsets = [0, 3], sizes = [8, 16], strides = [1, 1]} : vector<8x20xf32> to vector<8x16xf32>
    %10 = arith.addf %4, %9 : vector<8x16xf32>
    %11 = arith.addf %8, %10 : vector<8x16xf32>
    %cst_1 = arith.constant 2.000000e-01 : f32
    %12 = vector.broadcast %cst_1 : f32 to vector<8x16xf32>
    %13 = arith.mulf %11, %12 : vector<8x16xf32>
    %c0_2 = arith.constant 0 : index
    %c0_3 = arith.constant 0 : index
    %14 = vector.load %arg3[%c0_2, %c0_3] : memref<8x16xf32, #tpu.memory_space<vmem>>, vector<8x16xf32>
    tpu.vector_store %arg3[%c0_2, %c0_3], %13 {strides = array<i32>} : memref<8x16xf32, #tpu.memory_space<vmem>>, vector<8x16xf32>,
    %15 = arith.subf %0, %13 : vector<8x16xf32>
    %c0_4 = arith.constant 0 : index
    %c0_5 = arith.constant 0 : index
    %16 = vector.load %arg2[%c0_4, %c0_5] : memref<8x16xf32, #tpu.memory_space<vmem>>, vector<8x16xf32>
    tpu.vector_store %arg2[%c0_4, %c0_5], %15 {strides = array<i32>} : memref<8x16xf32, #tpu.memory_space<vmem>>, vector<8x16xf32>,
    return
  }
  func.func @transform_0(%arg0: i32) -> (i32, i32) {
    %c0_i32 = arith.constant 0 : i32
    %c0_i32_0 = arith.constant 0 : i32
    return %arg0, %c0_i32 : i32, i32
  }
  func.func @transform_1(%arg0: i32) -> (i32, i32) {
    %c0_i32 = arith.constant 0 : i32
    %c0_i32_0 = arith.constant 0 : i32
    return %arg0, %c0_i32 : i32, i32
  }
  func.func @transform_2(%arg0: i32) -> (i32, i32) {
    %c0_i32 = arith.constant 0 : i32
    %c0_i32_0 = arith.constant 0 : i32
    return %arg0, %c0_i32 : i32, i32
  }
}

</mosaic_0001>

<bundles_post_ra>
// kernel: tpu_custom_call.1
= control target key start
LH: loop header
LB: loop body
LE: loop exit
PB: predicated region body
PF: predicated region fallthrough
CT: control target
= control target key end

     0   :  { %8 = vsyncpa [#allocation3], 0  ;;  %s203_s0 = inlined_call_operand.hbm [shape: f32[8,16], index: 0, kind: input, shape index: {}]   ;;  %s204_s1 = inlined_call_operand.hbm [shape: f32[8,16], index: 1, kind: output, shape index: {0}]   ;;  %s205_s2 = inlined_call_operand.hbm [shape: f32[8,16], index: 2, kind: output, shape index: {1}]  }
   0x1   :  { %9 = vsyncpa [#allocation4], 0 }
   0x2   :  { %10 = vsyncpa [#allocation7], 0  ;;  %s16_s11 = sshll.u32 %s203_s0, 4  ;;  %s172_s12 = smov [#allocation2]   ;;  %s17_s11 = int_to_ptr.hbm [resolvable:$true] %s16_s11 }
   0x3   :  { %s18_s13 = sshll.u32 %s172_s12, 4  ;;  %s19_s13 = int_to_ptr.vmem [resolvable:$true] %s18_s13 }
   0x4   :  { %21 = dma.hbm_to_vmem [thread:$0]  %s17_s11, 128, %s19_s13, [#allocation3]  }
   0x5   :  { %166 = dma.done.wait [#allocation3], 128  }
   0x6   :  { %167 = vsyncadd [#allocation3], 4294967168  ;;  %v26_v0 = vld [vmem:[#allocation2] sm:$0xff]  ;;  %s173_s14 = smov 2   ;;  %vm31_vm0 = vcmask 15360   ;;  %vm33_vm1 = vcmask 146432  }
   0x7   :  { %28 = vrot.lane.b32.xlu0 %v26_v0, %s173_s14  ;;  %s174_s15 = smov 124   ;;  %s175_s16 = smov 126   ;;  %vm50_vm2 = vcmask 130048  }
   0x8   :  { %s176_s0 = smov 127   ;;  %s177_s17 = smov [#allocation6]  }
   0x9   :  { %s70_s18 = sshll.u32 %s177_s17, 4  ;;  %s72_s21 = sshll.u32 %s205_s2, 4  ;;  %s71_s18 = int_to_ptr.vmem [resolvable:$true] %s70_s18  ;;  %s73_s21 = int_to_ptr.hbm [resolvable:$true] %s72_s21 }
   0xa   :  { %s178_s22 = smov [#allocation5]   ;;  %s61_s26 = sshll.u32 %s204_s1, 4  ;;  %s62_s26 = int_to_ptr.hbm [resolvable:$true] %s61_s26 }
   0xb   :  { %s59_s23 = sshll.u32 %s178_s22, 4  ;;  %s60_s23 = int_to_ptr.vmem [resolvable:$true] %s59_s23 }
  0x79   :  { %v29_v1 = vpop.permute.xlu0 %28 }
  0x7a   :  { %v32_v2 = vsel %vm31_vm0, 0.0, %v29_v1 }
  0x7b   :  { %v34_v3 = vsel %vm33_vm1, %v32_v2, 0.0 }
  0x7c   :  { %40 = vrot.lane.b32.xlu1 %v34_v3, %s174_s15  ;;  %36 = vrot.lane.b32.xlu0 %v34_v3, %s175_s16 }
  0xee   :  { %v37_v4 = vpop.permute.xlu0 %36  ;;  %v41_v6 = vpop.permute.xlu1 %40 }
  0xef   :  { %v39_v5 = vadd.f32 %v37_v4, %v34_v3 }
  0xf1   :  { %45 = vrot.lane.b32.xlu1 %v39_v5, %s176_s0  ;;  %v43_v7 = vadd.f32 %v41_v6, %v39_v5 }
 0x163   :  { %v46_v8 = vpop.permute.xlu1 %45 }
 0x164   :  { %v48_v9 = vadd.f32 %v46_v8, %v43_v7 }
 0x166   :  { %v49_v10 = vmul.f32 0.2, %v48_v9 }
 0x168   :  { %v52_v11 = vsub.f32 %v26_v0, %v49_v10  ;;  %51 = vst.msk [vmem:[#allocation6] sm:$0xff] %vm50_vm2, %v49_v10 }
 0x169   :  { %75 = dma.vmem_to_hbm [thread:$0]  %s71_s18, 128, %s73_s21, [#allocation7]  }
 0x16a   :  { %53 = vst.msk [vmem:[#allocation5] sm:$0xff] %vm50_vm2, %v52_v11 }
 0x16b   :  { %64 = dma.vmem_to_hbm [thread:$0]  %s60_s23, 128, %s62_s26, [#allocation4]  }
 0x16c   :  { %168 = dma.done.wait [#allocation4], 128  }
 0x16d   :  { %169 = vsyncadd [#allocation4], 4294967168 }
 0x16e   :  { %170 = dma.done.wait [#allocation7], 128  }
 0x16f   :  { %171 = vsyncadd [#allocation7], 4294967168 }
 0x170   :  { %84 = vsyncpa [#allocation3], 1 }
 0x171   :  { %85 = vsyncpa [#allocation4], 1 }
 0x172   :  { %86 = vsyncpa [#allocation7], 1 }

</bundles_post_ra>
